<compile_context>
chip_gen: v7x
topology: tpu7x:2x2x1
jax: 0.10.0
libtpu: 0.0.40
codegen_flags: <defaults>
</compile_context>

<pallas_src>
import functools

import jax
import jax.numpy as jnp
from jax.experimental import pallas as pl
from jax.experimental.pallas import tpu as pltpu

_LANE = 128


def _round_up(n, m):
    return ((n + m - 1) // m) * m


def _cdiv(a, b):
    return -(-a // b)


def _pad_feature_dim(n):
    # <=128 -> 128 (min lane width, perfect fit for v5e's 128x128 MXU);
    # >128  -> multiple of 256 (v6e/v7x MXU is 256x256; 128-wide K/N half-fills it).
    return _LANE if n <= _LANE else _round_up(n, 2 * _LANE)


def _pad_latent_half(l):
    # Half-width of the fused [mu | logvar] head.  Multiple of 64 so the fused
    # 2*Lh output is always a multiple of 128 lanes; when 2L <= 128 both halves
    # pack into a single 128-lane block (mu in [0,64), logvar in [64,128)).
    return _round_up(l, 64)


def _vae_kernel(
    x_ref, eps_ref,
    w1_ref, b1_ref, w2_ref, b2_ref,
    wml_ref, bml_ref,
    wd1_ref, bd1_ref, wd2_ref, bd2_ref, wd3_ref, bd3_ref,
    recon_ref, mulv_ref,
):
    cdt = w1_ref.dtype  # matmul compute dtype (bf16)

    # Cast x inside the kernel (wrapper no longer burns an HBM pass on it).
    x = x_ref[...].astype(cdt)

    # ----- encoder -----
    h = jnp.dot(x, w1_ref[...], preferred_element_type=jnp.float32) + b1_ref[...]
    h = jnp.maximum(h, 0.0)                       # ReLU (f32)
    # TODO(synk): nn.Dropout is identity in eval mode; training-mode dropout not applied.
    h = jnp.dot(h.astype(cdt), w2_ref[...],
                preferred_element_type=jnp.float32) + b2_ref[...]
    h = jnp.maximum(h, 0.0)

    # ----- fused latent heads: [mu | logvar] in one lane-dense matmul -----
    mulv = jnp.dot(h.astype(cdt), wml_ref[...],
                   preferred_element_type=jnp.float32) + bml_ref[...]
    lp = mulv.shape[-1] // 2
    mu = mulv[:, :lp]
    logvar = mulv[:, lp:]
    # TODO(synk): logvar is a bf16-matmul product; if downstream KL terms are very
    # sensitive to exp(logvar), recompute this head with tighter precision.

    # ----- reparameterize (f32 epilogue; exp runs on the EUP slot) -----
    std = jnp.exp(0.5 * logvar)
    z = mu + eps_ref[...].astype(jnp.float32) * std

    # ----- decoder -----
    d = jnp.dot(z.astype(cdt), wd1_ref[...],
                preferred_element_type=jnp.float32) + bd1_ref[...]
    d = jnp.maximum(d, 0.0)
    d = jnp.dot(d.astype(cdt), wd2_ref[...],
                preferred_element_type=jnp.float32) + bd2_ref[...]
    d = jnp.maximum(d, 0.0)
    d = jnp.dot(d.astype(cdt), wd3_ref[...],
                preferred_element_type=jnp.float32) + bd3_ref[...]
    recon = jax.nn.sigmoid(d)                     # EUP

    recon_ref[...] = recon.astype(recon_ref.dtype)
    mulv_ref[...] = mulv.astype(mulv_ref.dtype)


def init_params(key, input_dim, hidden_dim, latent_dim):
    """Deterministic param init; weights stored as (in, out), biases as (1, out)."""
    dims = [
        ("w1", "b1", input_dim, hidden_dim),
        ("w2", "b2", hidden_dim, hidden_dim // 2),
        ("wmu", "bmu", hidden_dim // 2, latent_dim),
        ("wvar", "bvar", hidden_dim // 2, latent_dim),
        ("wd1", "bd1", latent_dim, hidden_dim // 2),
        ("wd2", "bd2", hidden_dim // 2, hidden_dim),
        ("wd3", "bd3", hidden_dim, input_dim),
    ]
    params = {}
    for wname, bname, fan_in, fan_out in dims:
        key, kw, kb = jax.random.split(key, 3)
        bound = 1.0 / jnp.sqrt(fan_in)
        params[wname] = jax.random.uniform(
            kw, (fan_in, fan_out), jnp.float32, -bound, bound)
        params[bname] = jax.random.uniform(
            kb, (1, fan_out), jnp.float32, -bound, bound)
    return params


def prepare_params(params, compute_dtype=jnp.bfloat16):
    """One-time: zero-pad feature dims, cast weights to bf16, fuse & pack heads."""
    input_dim, hidden_dim = params["w1"].shape
    h2 = params["w2"].shape[1]
    latent_dim = params["wmu"].shape[1]

    Dp = _pad_feature_dim(input_dim)
    Hp = _pad_feature_dim(hidden_dim)
    H2p = _pad_feature_dim(h2)
    Lh = _pad_latent_half(latent_dim)

    def pad_w(w, rp, cp):
        r, c = w.shape
        return jnp.pad(w, ((0, rp - r), (0, cp - c))).astype(compute_dtype)

    def pad_b(b, cp):
        return jnp.pad(b, ((0, 0), (0, cp - b.shape[1]))).astype(jnp.float32)

    return {
        "w1": pad_w(params["w1"], Dp, Hp),   "b1": pad_b(params["b1"], Hp),
        "w2": pad_w(params["w2"], Hp, H2p),  "b2": pad_b(params["b2"], H2p),
        # Packed fused head: mu in cols [0, Lh), logvar in [Lh, 2*Lh).
        "wml": jnp.concatenate([pad_w(params["wmu"], H2p, Lh),
                                pad_w(params["wvar"], H2p, Lh)], axis=1),
        "bml": jnp.concatenate([pad_b(params["bmu"], Lh),
                                pad_b(params["bvar"], Lh)], axis=1),
        "wd1": pad_w(params["wd1"], Lh, H2p), "bd1": pad_b(params["bd1"], H2p),
        "wd2": pad_w(params["wd2"], H2p, Hp), "bd2": pad_b(params["bd2"], Hp),
        "wd3": pad_w(params["wd3"], Hp, Dp),  "bd3": pad_b(params["bd3"], Dp),
    }


@functools.partial(jax.jit, static_argnames=("block_b",))
def vae_forward(x, eps, prepped, block_b=512):
    """Full VAE forward in one batch-tiled Pallas call."""
    B, D = x.shape
    L = eps.shape[1]
    Dp, Hp = prepped["w1"].shape
    H2p = prepped["w2"].shape[1]
    Lh = prepped["wml"].shape[1] // 2
    compute_dtype = prepped["w1"].dtype

    # --- tile / grid selection ---
    # Bound batch padding to < 8 rows per step and give the grid >= 2 (even)
    # steps whenever B is large enough, so v7x's two TensorCores both get work.
    n_steps = _cdiv(B, block_b)
    if B >= 16:
        n_steps = max(n_steps, 2)
    if n_steps > 1 and n_steps % 2:
        n_steps += 1
    TB = _round_up(_cdiv(B, n_steps), 8)
    B_pad = n_steps * TB

    # --- inputs: pad only when needed; x dtype preserved (cast happens in-kernel) ---
    if (B_pad, Dp) == (B, D):
        x_p = x
    else:
        x_p = jnp.pad(x, ((0, B_pad - B), (0, Dp - D)))
    if (B_pad, Lh) == (B, L) and eps.dtype == compute_dtype:
        eps_p = eps
    else:
        eps_p = jnp.pad(eps, ((0, B_pad - B), (0, Lh - L))).astype(compute_dtype)

    weight_order = ("w1", "b1", "w2", "b2", "wml", "bml",
                    "wd1", "bd1", "wd2", "bd2", "wd3", "bd3")
    weights = tuple(prepped[k] for k in weight_order)

    row_spec = lambda cols: pl.BlockSpec((TB, cols), lambda i: (i, 0))
    # Weights/biases never change across grid steps -> single-buffer them
    # (frees VMEM, matters on v7x's 64 MiB).
    const_spec = lambda arr: pl.BlockSpec(arr.shape, lambda i: (0, 0),
                                          pipeline_mode=pl.Buffered(1))

    in_specs = [row_spec(Dp), row_spec(Lh)] + [const_spec(w) for w in weights]
    out_specs = (row_spec(Dp), row_spec(2 * Lh))
    out_shape = (
        jax.ShapeDtypeStruct((B_pad, Dp), x.dtype),           # reconstruction (x dtype)
        jax.ShapeDtypeStruct((B_pad, 2 * Lh), jnp.float32),   # packed [mu | logvar]
    )

    # --- explicit scoped-VMEM budget from the tile footprint ---
    weight_bytes = sum(w.size * w.dtype.itemsize for w in weights)    # 1 buffer each
    io_tile_bytes = TB * (Dp * x.dtype.itemsize            # x tile
                          + Lh * eps_p.dtype.itemsize      # eps tile
                          + Dp * x.dtype.itemsize          # recon tile
                          + 2 * Lh * 4)                    # mulv tile
    temp_bytes = TB * (Hp + H2p + 2 * Lh + H2p + Hp + Dp) * 6   # f32 temps + bf16 casts
    vmem_need = weight_bytes + 2 * io_tile_bytes + temp_bytes
    vmem_limit = int(min(max(2 * vmem_need, 32 * 1024 * 1024), 64 * 1024 * 1024))

    flops = 2 * B_pad * (Dp * Hp + Hp * H2p + H2p * (2 * Lh)
                         + Lh * H2p + H2p * Hp + Hp * Dp)
    transcendentals = B_pad * (Lh + Dp)  # exp + sigmoid
    bytes_accessed = (
        x_p.size * x_p.dtype.itemsize + eps_p.size * eps_p.dtype.itemsize
        + weight_bytes
        + B_pad * Dp * x.dtype.itemsize + B_pad * 2 * Lh * 4)

    recon_p, mulv_p = pl.pallas_call(
        _vae_kernel,
        out_shape=out_shape,
        grid=(n_steps,),
        in_specs=in_specs,
        out_specs=out_specs,
        compiler_params=pltpu.CompilerParams(
            dimension_semantics=("parallel",),
            vmem_limit_bytes=vmem_limit),
        cost_estimate=pl.CostEstimate(
            flops=int(flops),
            transcendentals=int(transcendentals),
            bytes_accessed=int(bytes_accessed)),
    )(x_p, eps_p, *weights)

    recon = recon_p[:B, :D]
    mu = mulv_p[:B, :L]
    logvar = mulv_p[:B, Lh:Lh + L]
    return recon, mu, logvar


def reference_forward(x, eps, params, compute_dtype=jnp.float32):
    """Plain-JAX reference (eval-mode dropout).  compute_dtype=bfloat16 mirrors the
    kernel's bf16 matmul inputs / bf16 eps with f32 accumulation."""
    cd = compute_dtype
    dot = lambda a, b: jnp.dot(a.astype(cd), b.astype(cd),
                               preferred_element_type=jnp.float32)
    relu = lambda t: jnp.maximum(t, 0.0)
    h = relu(dot(x, params["w1"]) + params["b1"])
    h = relu(dot(h, params["w2"]) + params["b2"])
    mu = dot(h, params["wmu"]) + params["bmu"]
    logvar = dot(h, params["wvar"]) + params["bvar"]
    z = mu + eps.astype(cd).astype(jnp.float32) * jnp.exp(0.5 * logvar)
    d = relu(dot(z, params["wd1"]) + params["bd1"])
    d = relu(dot(d, params["wd2"]) + params["bd2"])
    recon = jax.nn.sigmoid(dot(d, params["wd3"]) + params["bd3"])
    return recon, mu, logvar


if __name__ == "__main__":
    input_dim, hidden_dim, latent_dim = 16, 32, 8
    batch = 8

    key = jax.random.PRNGKey(0)
    key, kx, keps, kp = jax.random.split(key, 4)

    x = jax.random.uniform(kx, (batch, input_dim), jnp.float32)
    eps = jax.random.normal(keps, (batch, latent_dim), jnp.float32)
    params = init_params(kp, input_dim, hidden_dim, latent_dim)
    prepped = prepare_params(params)

    recon, mu, logvar = vae_forward(x, eps, prepped)
    jax.block_until_ready((recon, mu, logvar))

    # Tight check vs a reference with identical numerics (bf16 matmuls/eps, f32 acc).
    r_b, mu_b, lv_b = reference_forward(x, eps, params, compute_dtype=jnp.bfloat16)
    assert jnp.allclose(recon, r_b, atol=5e-3), "recon mismatch (bf16 ref)"
    assert jnp.allclose(mu, mu_b, atol=5e-3), "mu mismatch (bf16 ref)"
    assert jnp.allclose(logvar, lv_b, atol=5e-3), "logvar mismatch (bf16 ref)"

    # Loose sanity check vs the full-f32 reference (difference = bf16 rounding).
    r_f, mu_f, lv_f = reference_forward(x, eps, params)
    assert jnp.allclose(recon, r_f, atol=5e-2, rtol=5e-2), "recon mismatch (f32 ref)"
    assert jnp.allclose(mu, mu_f, atol=5e-2, rtol=5e-2), "mu mismatch (f32 ref)"
    assert jnp.allclose(logvar, lv_f, atol=5e-2, rtol=5e-2), "logvar mismatch (f32 ref)"

    print("KERNEL_OK")
</pallas_src>

<mosaic_0001>
module attributes {stable_mosaic.version = 11 : i64} {
  func.func @_vae_kernel(%arg0: i32, %arg1: memref<8x128xf32, #tpu.memory_space<vmem>>, %arg2: memref<8x64xbf16, #tpu.memory_space<vmem>>, %arg3: memref<128x128xbf16, #tpu.memory_space<vmem>>, %arg4: memref<1x128xf32, #tpu.memory_space<vmem>>, %arg5: memref<128x128xbf16, #tpu.memory_space<vmem>>, %arg6: memref<1x128xf32, #tpu.memory_space<vmem>>, %arg7: memref<128x128xbf16, #tpu.memory_space<vmem>>, %arg8: memref<1x128xf32, #tpu.memory_space<vmem>>, %arg9: memref<64x128xbf16, #tpu.memory_space<vmem>>, %arg10: memref<1x128xf32, #tpu.memory_space<vmem>>, %arg11: memref<128x128xbf16, #tpu.memory_space<vmem>>, %arg12: memref<1x128xf32, #tpu.memory_space<vmem>>, %arg13: memref<128x128xbf16, #tpu.memory_space<vmem>>, %arg14: memref<1x128xf32, #tpu.memory_space<vmem>>, %arg15: memref<8x128xf32, #tpu.memory_space<vmem>>, %arg16: memref<8x128xf32, #tpu.memory_space<vmem>>) attributes {dimension_semantics = [#tpu.dimension_semantics<parallel>], iteration_bounds = array<i64: 1>, scalar_prefetch = 0 : i64, scratch_operands = 0 : i64, tpu.core_type = #tpu.core_type<tc>, window_params = [{transform_indices = @transform_0, window_bounds = array<i64: 8, 128>}, {transform_indices = @transform_1, window_bounds = array<i64: 8, 64>}, {pipeline_mode = #tpu.pipeline_mode<synchronous>, transform_indices = @transform_2, window_bounds = array<i64: 128, 128>}, {pipeline_mode = #tpu.pipeline_mode<synchronous>, transform_indices = @transform_3, window_bounds = array<i64: 1, 128>}, {pipeline_mode = #tpu.pipeline_mode<synchronous>, transform_indices = @transform_4, window_bounds = array<i64: 128, 128>}, {pipeline_mode = #tpu.pipeline_mode<synchronous>, transform_indices = @transform_5, window_bounds = array<i64: 1, 128>}, {pipeline_mode = #tpu.pipeline_mode<synchronous>, transform_indices = @transform_6, window_bounds = array<i64: 128, 128>}, {pipeline_mode = #tpu.pipeline_mode<synchronous>, transform_indices = @transform_7, window_bounds = array<i64: 1, 128>}, {pipeline_mode = #tpu.pipeline_mode<synchronous>, transform_indices = @transform_8, window_bounds = array<i64: 64, 128>}, {pipeline_mode = #tpu.pipeline_mode<synchronous>, transform_indices = @transform_9, window_bounds = array<i64: 1, 128>}, {pipeline_mode = #tpu.pipeline_mode<synchronous>, transform_indices = @transform_10, window_bounds = array<i64: 128, 128>}, {pipeline_mode = #tpu.pipeline_mode<synchronous>, transform_indices = @transform_11, window_bounds = array<i64: 1, 128>}, {pipeline_mode = #tpu.pipeline_mode<synchronous>, transform_indices = @transform_12, window_bounds = array<i64: 128, 128>}, {pipeline_mode = #tpu.pipeline_mode<synchronous>, transform_indices = @transform_13, window_bounds = array<i64: 1, 128>}, {transform_indices = @transform_14, window_bounds = array<i64: 8, 128>}, {transform_indices = @transform_15, window_bounds = array<i64: 8, 128>}]} {
    %c0 = arith.constant 0 : index
    %c0_0 = arith.constant 0 : index
    %0 = vector.load %arg1[%c0, %c0_0] : memref<8x128xf32, #tpu.memory_space<vmem>>, vector<8x128xf32>
    %1 = arith.truncf %0 : vector<8x128xf32> to vector<8x128xbf16>
    %c0_1 = arith.constant 0 : index
    %c0_2 = arith.constant 0 : index
    %2 = vector.load %arg3[%c0_1, %c0_2] : memref<128x128xbf16, #tpu.memory_space<vmem>>, vector<128x128xbf16>
    %cst = arith.constant dense<0.000000e+00> : vector<8x128xf32>
    %3 = tpu.matmul %1, %2, %cst {dimension_numbers = #tpu.dot_dimension_numbers<[1], [0], [0], [1], [0, 0, 1, 1], [], []>} : vector<8x128xbf16>, vector<128x128xbf16>, vector<8x128xf32> -> vector<8x128xf32>
    %c0_3 = arith.constant 0 : index
    %c0_4 = arith.constant 0 : index
    %4 = vector.load %arg4[%c0_3, %c0_4] : memref<1x128xf32, #tpu.memory_space<vmem>>, vector<1x128xf32>
    %5 = vector.broadcast %4 : vector<1x128xf32> to vector<8x128xf32>
    %6 = arith.addf %3, %5 : vector<8x128xf32>
    %cst_5 = arith.constant 0.000000e+00 : f32
    %7 = vector.broadcast %cst_5 : f32 to vector<8x128xf32>
    %8 = arith.maximumf %6, %7 : vector<8x128xf32>
    %9 = arith.truncf %8 : vector<8x128xf32> to vector<8x128xbf16>
    %c0_6 = arith.constant 0 : index
    %c0_7 = arith.constant 0 : index
    %10 = vector.load %arg5[%c0_6, %c0_7] : memref<128x128xbf16, #tpu.memory_space<vmem>>, vector<128x128xbf16>
    %cst_8 = arith.constant dense<0.000000e+00> : vector<8x128xf32>
    %11 = tpu.matmul %9, %10, %cst_8 {dimension_numbers = #tpu.dot_dimension_numbers<[1], [0], [0], [1], [0, 0, 1, 1], [], []>} : vector<8x128xbf16>, vector<128x128xbf16>, vector<8x128xf32> -> vector<8x128xf32>
    %c0_9 = arith.constant 0 : index
    %c0_10 = arith.constant 0 : index
    %12 = vector.load %arg6[%c0_9, %c0_10] : memref<1x128xf32, #tpu.memory_space<vmem>>, vector<1x128xf32>
    %13 = vector.broadcast %12 : vector<1x128xf32> to vector<8x128xf32>
    %14 = arith.addf %11, %13 : vector<8x128xf32>
    %cst_11 = arith.constant 0.000000e+00 : f32
    %15 = vector.broadcast %cst_11 : f32 to vector<8x128xf32>
    %16 = arith.maximumf %14, %15 : vector<8x128xf32>
    %17 = arith.truncf %16 : vector<8x128xf32> to vector<8x128xbf16>
    %c0_12 = arith.constant 0 : index
    %c0_13 = arith.constant 0 : index
    %18 = vector.load %arg7[%c0_12, %c0_13] : memref<128x128xbf16, #tpu.memory_space<vmem>>, vector<128x128xbf16>
    %cst_14 = arith.constant dense<0.000000e+00> : vector<8x128xf32>
    %19 = tpu.matmul %17, %18, %cst_14 {dimension_numbers = #tpu.dot_dimension_numbers<[1], [0], [0], [1], [0, 0, 1, 1], [], []>} : vector<8x128xbf16>, vector<128x128xbf16>, vector<8x128xf32> -> vector<8x128xf32>
    %c0_15 = arith.constant 0 : index
    %c0_16 = arith.constant 0 : index
    %20 = vector.load %arg8[%c0_15, %c0_16] : memref<1x128xf32, #tpu.memory_space<vmem>>, vector<1x128xf32>
    %21 = vector.broadcast %20 : vector<1x128xf32> to vector<8x128xf32>
    %22 = arith.addf %19, %21 : vector<8x128xf32>
    %23 = vector.extract_strided_slice %22 {offsets = [0, 0], sizes = [8, 64], strides = [1, 1]} : vector<8x128xf32> to vector<8x64xf32>
    %24 = vector.extract_strided_slice %22 {offsets = [0, 64], sizes = [8, 64], strides = [1, 1]} : vector<8x128xf32> to vector<8x64xf32>
    %cst_17 = arith.constant 5.000000e-01 : f32
    %25 = vector.broadcast %cst_17 : f32 to vector<8x64xf32>
    %26 = arith.mulf %25, %24 : vector<8x64xf32>
    %27 = math.exp %26 : vector<8x64xf32>
    %c0_18 = arith.constant 0 : index
    %c0_19 = arith.constant 0 : index
    %28 = vector.load %arg2[%c0_18, %c0_19] : memref<8x64xbf16, #tpu.memory_space<vmem>>, vector<8x64xbf16>
    %29 = arith.extf %28 : vector<8x64xbf16> to vector<8x64xf32>
    %30 = arith.mulf %29, %27 : vector<8x64xf32>
    %31 = arith.addf %23, %30 : vector<8x64xf32>
    %32 = arith.truncf %31 : vector<8x64xf32> to vector<8x64xbf16>
    %c0_20 = arith.constant 0 : index
    %c0_21 = arith.constant 0 : index
    %33 = vector.load %arg9[%c0_20, %c0_21] : memref<64x128xbf16, #tpu.memory_space<vmem>>, vector<64x128xbf16>
    %cst_22 = arith.constant dense<0.000000e+00> : vector<8x128xf32>
    %34 = tpu.matmul %32, %33, %cst_22 {dimension_numbers = #tpu.dot_dimension_numbers<[1], [0], [0], [1], [0, 0, 1, 1], [], []>} : vector<8x64xbf16>, vector<64x128xbf16>, vector<8x128xf32> -> vector<8x128xf32>
    %c0_23 = arith.constant 0 : index
    %c0_24 = arith.constant 0 : index
    %35 = vector.load %arg10[%c0_23, %c0_24] : memref<1x128xf32, #tpu.memory_space<vmem>>, vector<1x128xf32>
    %36 = vector.broadcast %35 : vector<1x128xf32> to vector<8x128xf32>
    %37 = arith.addf %34, %36 : vector<8x128xf32>
    %cst_25 = arith.constant 0.000000e+00 : f32
    %38 = vector.broadcast %cst_25 : f32 to vector<8x128xf32>
    %39 = arith.maximumf %37, %38 : vector<8x128xf32>
    %40 = arith.truncf %39 : vector<8x128xf32> to vector<8x128xbf16>
    %c0_26 = arith.constant 0 : index
    %c0_27 = arith.constant 0 : index
    %41 = vector.load %arg11[%c0_26, %c0_27] : memref<128x128xbf16, #tpu.memory_space<vmem>>, vector<128x128xbf16>
    %cst_28 = arith.constant dense<0.000000e+00> : vector<8x128xf32>
    %42 = tpu.matmul %40, %41, %cst_28 {dimension_numbers = #tpu.dot_dimension_numbers<[1], [0], [0], [1], [0, 0, 1, 1], [], []>} : vector<8x128xbf16>, vector<128x128xbf16>, vector<8x128xf32> -> vector<8x128xf32>
    %c0_29 = arith.constant 0 : index
    %c0_30 = arith.constant 0 : index
    %43 = vector.load %arg12[%c0_29, %c0_30] : memref<1x128xf32, #tpu.memory_space<vmem>>, vector<1x128xf32>
    %44 = vector.broadcast %43 : vector<1x128xf32> to vector<8x128xf32>
    %45 = arith.addf %42, %44 : vector<8x128xf32>
    %cst_31 = arith.constant 0.000000e+00 : f32
    %46 = vector.broadcast %cst_31 : f32 to vector<8x128xf32>
    %47 = arith.maximumf %45, %46 : vector<8x128xf32>
    %48 = arith.truncf %47 : vector<8x128xf32> to vector<8x128xbf16>
    %c0_32 = arith.constant 0 : index
    %c0_33 = arith.constant 0 : index
    %49 = vector.load %arg13[%c0_32, %c0_33] : memref<128x128xbf16, #tpu.memory_space<vmem>>, vector<128x128xbf16>
    %cst_34 = arith.constant dense<0.000000e+00> : vector<8x128xf32>
    %50 = tpu.matmul %48, %49, %cst_34 {dimension_numbers = #tpu.dot_dimension_numbers<[1], [0], [0], [1], [0, 0, 1, 1], [], []>} : vector<8x128xbf16>, vector<128x128xbf16>, vector<8x128xf32> -> vector<8x128xf32>
    %c0_35 = arith.constant 0 : index
    %c0_36 = arith.constant 0 : index
    %51 = vector.load %arg14[%c0_35, %c0_36] : memref<1x128xf32, #tpu.memory_space<vmem>>, vector<1x128xf32>
    %52 = vector.broadcast %51 : vector<1x128xf32> to vector<8x128xf32>
    %53 = arith.addf %50, %52 : vector<8x128xf32>
    %54 = arith.negf %53 : vector<8x128xf32>
    %55 = math.exp %54 : vector<8x128xf32>
    %cst_37 = arith.constant 1.000000e+00 : f32
    %56 = vector.broadcast %cst_37 : f32 to vector<8x128xf32>
    %57 = arith.addf %56, %55 : vector<8x128xf32>
    %58 = arith.divf %56, %57 : vector<8x128xf32>
    %c0_38 = arith.constant 0 : index
    %c0_39 = arith.constant 0 : index
    %59 = vector.load %arg15[%c0_38, %c0_39] : memref<8x128xf32, #tpu.memory_space<vmem>>, vector<8x128xf32>
    tpu.vector_store %arg15[%c0_38, %c0_39], %58 {strides = array<i32>} : memref<8x128xf32, #tpu.memory_space<vmem>>, vector<8x128xf32>,
    %c0_40 = arith.constant 0 : index
    %c0_41 = arith.constant 0 : index
    %60 = vector.load %arg16[%c0_40, %c0_41] : memref<8x128xf32, #tpu.memory_space<vmem>>, vector<8x128xf32>
    tpu.vector_store %arg16[%c0_40, %c0_41], %22 {strides = array<i32>} : memref<8x128xf32, #tpu.memory_space<vmem>>, vector<8x128xf32>,
    return
  }
  func.func @transform_0(%arg0: i32) -> (i32, i32) {
    %c0_i32 = arith.constant 0 : i32
    %c0_i32_0 = arith.constant 0 : i32
    return %arg0, %c0_i32 : i32, i32
  }
  func.func @transform_1(%arg0: i32) -> (i32, i32) {
    %c0_i32 = arith.constant 0 : i32
    %c0_i32_0 = arith.constant 0 : i32
    return %arg0, %c0_i32 : i32, i32
  }
  func.func @transform_2(%arg0: i32) -> (i32, i32) {
    %c0_i32 = arith.constant 0 : i32
    %c0_i32_0 = arith.constant 0 : i32
    %c0_i32_1 = arith.constant 0 : i32
    return %c0_i32, %c0_i32_0 : i32, i32
  }
  func.func @transform_3(%arg0: i32) -> (i32, i32) {
    %c0_i32 = arith.constant 0 : i32
    %c0_i32_0 = arith.constant 0 : i32
    %c0_i32_1 = arith.constant 0 : i32
    return %c0_i32, %c0_i32_0 : i32, i32
  }
  func.func @transform_4(%arg0: i32) -> (i32, i32) {
    %c0_i32 = arith.constant 0 : i32
    %c0_i32_0 = arith.constant 0 : i32
    %c0_i32_1 = arith.constant 0 : i32
    return %c0_i32, %c0_i32_0 : i32, i32
  }
  func.func @transform_5(%arg0: i32) -> (i32, i32) {
    %c0_i32 = arith.constant 0 : i32
    %c0_i32_0 = arith.constant 0 : i32
    %c0_i32_1 = arith.constant 0 : i32
    return %c0_i32, %c0_i32_0 : i32, i32
  }
  func.func @transform_6(%arg0: i32) -> (i32, i32) {
    %c0_i32 = arith.constant 0 : i32
    %c0_i32_0 = arith.constant 0 : i32
    %c0_i32_1 = arith.constant 0 : i32
    return %c0_i32, %c0_i32_0 : i32, i32
  }
  func.func @transform_7(%arg0: i32) -> (i32, i32) {
    %c0_i32 = arith.constant 0 : i32
    %c0_i32_0 = arith.constant 0 : i32
    %c0_i32_1 = arith.constant 0 : i32
    return %c0_i32, %c0_i32_0 : i32, i32
  }
  func.func @transform_8(%arg0: i32) -> (i32, i32) {
    %c0_i32 = arith.constant 0 : i32
    %c0_i32_0 = arith.constant 0 : i32
    %c0_i32_1 = arith.constant 0 : i32
    return %c0_i32, %c0_i32_0 : i32, i32
  }
  func.func @transform_9(%arg0: i32) -> (i32, i32) {
    %c0_i32 = arith.constant 0 : i32
    %c0_i32_0 = arith.constant 0 : i32
    %c0_i32_1 = arith.constant 0 : i32
    return %c0_i32, %c0_i32_0 : i32, i32
  }
  func.func @transform_10(%arg0: i32) -> (i32, i32) {
    %c0_i32 = arith.constant 0 : i32
    %c0_i32_0 = arith.constant 0 : i32
    %c0_i32_1 = arith.constant 0 : i32
    return %c0_i32, %c0_i32_0 : i32, i32
  }
  func.func @transform_11(%arg0: i32) -> (i32, i32) {
    %c0_i32 = arith.constant 0 : i32
    %c0_i32_0 = arith.constant 0 : i32
    %c0_i32_1 = arith.constant 0 : i32
    return %c0_i32, %c0_i32_0 : i32, i32
  }
  func.func @transform_12(%arg0: i32) -> (i32, i32) {
    %c0_i32 = arith.constant 0 : i32
    %c0_i32_0 = arith.constant 0 : i32
    %c0_i32_1 = arith.constant 0 : i32
    return %c0_i32, %c0_i32_0 : i32, i32
  }
  func.func @transform_13(%arg0: i32) -> (i32, i32) {
    %c0_i32 = arith.constant 0 : i32
    %c0_i32_0 = arith.constant 0 : i32
    %c0_i32_1 = arith.constant 0 : i32
    return %c0_i32, %c0_i32_0 : i32, i32
  }
  func.func @transform_14(%arg0: i32) -> (i32, i32) {
    %c0_i32 = arith.constant 0 : i32
    %c0_i32_0 = arith.constant 0 : i32
    return %arg0, %c0_i32 : i32, i32
  }
  func.func @transform_15(%arg0: i32) -> (i32, i32) {
    %c0_i32 = arith.constant 0 : i32
    %c0_i32_0 = arith.constant 0 : i32
    return %arg0, %c0_i32 : i32, i32
  }
}

</mosaic_0001>

<bundles_post_ra>
// kernel: vae_forward.1
= control target key start
LH: loop header
LB: loop body
LE: loop exit
PB: predicated region body
PF: predicated region fallthrough
CT: control target
= control target key end

     0   :  { %21 = vsyncpa [#allocation3], 0  ;;  %s1613_s0 = inlined_call_operand.vmem [shape: f32[8,128], index: 0, kind: input, shape index: {}]   ;;  %s1614_s1 = inlined_call_operand.vmem [shape: bf16[8,64], index: 1, kind: input, shape index: {}]   ;;  %s1615_s2 = inlined_call_operand.vmem [shape: bf16[128,128], index: 2, kind: input, shape index: {}]   ;;  %s1616_s3 = inlined_call_operand.vmem [shape: f32[1,128], index: 3, kind: input, shape index: {}]   ;;  %s1617_s4 = inlined_call_operand.hbm [shape: bf16[128,128], index: 4, kind: input, shape index: {}]   ;;  %s1618_s5 = inlined_call_operand.vmem [shape: f32[1,128], index: 5, kind: input, shape index: {}]   ;;  %s1619_s6 = inlined_call_operand.hbm [shape: bf16[128,128], index: 6, kind: input, shape index: {}]   ;;  %s1620_s7 = inlined_call_operand.vmem [shape: f32[1,128], index: 7, kind: input, shape index: {}]   ;;  %s1621_s8 = inlined_call_operand.hbm [shape: bf16[64,128], index: 8, kind: input, shape index: {}]   ;;  %s1622_s9 = inlined_call_operand.vmem [shape: f32[1,128], index: 9, kind: input, shape index: {}]   ;;  %s1623_s10 = inlined_call_operand.hbm [shape: bf16[128,128], index: 10, kind: input, shape index: {}]   ;;  %s1624_s11 = inlined_call_operand.hbm [shape: f32[1,128], index: 11, kind: input, shape index: {}]   ;;  %s1625_s12 = inlined_call_operand.hbm [shape: bf16[128,128], index: 12, kind: input, shape index: {}]   ;;  %s1626_s13 = inlined_call_operand.hbm [shape: f32[1,128], index: 13, kind: input, shape index: {}]   ;;  %s1627_s14 = inlined_call_operand.hbm [shape: f32[8,128], index: 14, kind: output, shape index: {0}]   ;;  %s1628_s15 = inlined_call_operand.vmem [shape: f32[8,128], index: 15, kind: output, shape index: {1}]  }
   0x1   :  { %22 = vsyncpa [#allocation6], 0 }
   0x2   :  { %23 = vsyncpa [#allocation9], 0 }
   0x3   :  { %24 = vsyncpa [#allocation12], 0 }
   0x4   :  { %25 = vsyncpa [#allocation4], 0  ;;  %s1294_s18 = smov [#allocation5]   ;;  %s1295_s20 = smov [#allocation8]  }
   0x5   :  { %s53_s19 = sshll.u32 %s1294_s18, 4  ;;  %s81_s21 = sshll.u32 %s1295_s20, 4  ;;  %s54_s19 = int_to_ptr.vmem [resolvable:$true] %s53_s19  ;;  %s1386_s21 = int_to_ptr.vmem [resolvable:$true] %s81_s21 }
   0x6   :  { %s1108_s24 = scalar_lea.hbm %s1619_s6, 1024 }
   0x7   :  { %p1109_p0 = scmp.ne.s32.totalorder %s1619_s6, %s1108_s24  ;;  %p1112_p1 = scmp.lt.u32.totalorder %s1108_s24, %s1619_s6 }
   0x9   :  { %p1114_p2 = pnand %p1112_p1, %p1109_p0 }
   0xb   :  { %1117 = shalt.err (!%p1114_p2)
}
   0xc   :  { %s1118_s29 = scalar_lea.vmem %s54_s19, 1024  ;;  %p1123_p4 = scmp.lt.s32.totalorder %s54_s19, %s54_s19 }
   0xd   :  { %p1119_p3 = scmp.ne.s32.totalorder %s54_s19, %s1118_s29  ;;  %p1124_p5 = scmp.lt.s32.totalorder %s1118_s29, %s1118_s29 }
   0xf   :  { %p1125_p6 = por %p1124_p5, %p1123_p4 }
  0x11   :  { %p1126_p7 = pnand %p1125_p6, %p1119_p3 }
  0x13   :  { %1129 = shalt.err (!%p1126_p7)
}
  0x14   :  { %s1296_s30 = smov 64   ;;  %s1297_s16 = smov 4  }
  0x15   :  { %59 = dma.hbm_to_vmem [thread:$0]  %s1619_s6, 1024, %s54_s19, [#allocation6], %s1296_s30, %s1296_s30, %s1297_s16  }
  0x16   :  { %s1130_s23 = scalar_lea.hbm %s1623_s10, 1024 }
  0x17   :  { %p1131_p8 = scmp.ne.s32.totalorder %s1623_s10, %s1130_s23  ;;  %p1134_p9 = scmp.lt.u32.totalorder %s1130_s23, %s1623_s10 }
  0x19   :  { %p1136_p10 = pnand %p1134_p9, %p1131_p8 }
  0x1b   :  { %1139 = shalt.err (!%p1136_p10)
}
  0x1c   :  { %s1140_s28 = scalar_lea.vmem %s1386_s21, 1024  ;;  %p1145_p12 = scmp.lt.s32.totalorder %s1386_s21, %s1386_s21 }
  0x1d   :  { %p1141_p11 = scmp.ne.s32.totalorder %s1386_s21, %s1140_s28  ;;  %p1146_p13 = scmp.lt.s32.totalorder %s1140_s28, %s1140_s28 }
  0x1f   :  { %p1147_p0 = por %p1146_p13, %p1145_p12 }
  0x21   :  { %p1148_p1 = pnand %p1147_p0, %p1141_p11 }
  0x23   :  { %1151 = shalt.err (!%p1148_p1)
}
  0x24   :  { %87 = dma.hbm_to_vmem [thread:$0]  %s1623_s10, 1024, %s1386_s21, [#allocation9], %s1296_s30, %s1296_s30, %s1297_s16  }
  0x25   :  { %s1298_s29 = smov [#allocation11]   ;;  %s1299_s18 = smov [#allocation2]  }
  0x26   :  { %s103_s17 = sshll.u32 %s1298_s29, 4  ;;  %s39_s20 = sshll.u32 %s1299_s18, 4  ;;  %s104_s17 = int_to_ptr.vmem [resolvable:$true] %s103_s17  ;;  %s1423_s20 = int_to_ptr.vmem [resolvable:$true] %s39_s20 }
  0x27   :  { %s1152_s24 = scalar_lea.hbm %s1625_s12, 1024 }
  0x28   :  { %p1153_p2 = scmp.ne.s32.totalorder %s1625_s12, %s1152_s24  ;;  %p1156_p3 = scmp.lt.u32.totalorder %s1152_s24, %s1625_s12 }
  0x2a   :  { %p1158_p4 = pnand %p1156_p3, %p1153_p2 }
  0x2c   :  { %1161 = shalt.err (!%p1158_p4)
}
  0x2d   :  { %s1162_s10 = scalar_lea.vmem %s104_s17, 1024  ;;  %p1167_p6 = scmp.lt.s32.totalorder %s104_s17, %s104_s17 }
  0x2e   :  { %p1163_p5 = scmp.ne.s32.totalorder %s104_s17, %s1162_s10  ;;  %p1168_p7 = scmp.lt.s32.totalorder %s1162_s10, %s1162_s10 }
  0x30   :  { %p1169_p8 = por %p1168_p7, %p1167_p6 }
  0x32   :  { %p1170_p9 = pnand %p1169_p8, %p1163_p5 }
  0x34   :  { %1173 = shalt.err (!%p1170_p9)
}
  0x35   :  { %109 = dma.hbm_to_vmem [thread:$0]  %s1625_s12, 1024, %s104_s17, [#allocation12], %s1296_s30, %s1296_s30, %s1297_s16  }
  0x36   :  { %s1174_s18 = scalar_lea.hbm %s1617_s4, 1024 }
  0x37   :  { %p1175_p10 = scmp.ne.s32.totalorder %s1617_s4, %s1174_s18  ;;  %p1178_p11 = scmp.lt.u32.totalorder %s1174_s18, %s1617_s4 }
  0x39   :  { %p1180_p12 = pnand %p1178_p11, %p1175_p10 }
  0x3b   :  { %1183 = shalt.err (!%p1180_p12)
}
  0x3c   :  { %s1184_s26 = scalar_lea.vmem %s1423_s20, 1024  ;;  %p1189_p0 = scmp.lt.s32.totalorder %s1423_s20, %s1423_s20 }
  0x3d   :  { %p1185_p13 = scmp.ne.s32.totalorder %s1423_s20, %s1184_s26  ;;  %p1190_p1 = scmp.lt.s32.totalorder %s1184_s26, %s1184_s26 }
  0x3f   :  { %p1191_p2 = por %p1190_p1, %p1189_p0 }
  0x41   :  { %p1192_p3 = pnand %p1191_p2, %p1185_p13 }
  0x43   :  { %1195 = shalt.err (!%p1192_p3)
}
  0x44   :  { %45 = dma.hbm_to_vmem [thread:$0]  %s1617_s4, 1024, %s1423_s20, [#allocation3], %s1296_s30, %s1296_s30, %s1297_s16  }
  0x45   :  { %s1300_s27 = smov [#allocation7]   ;;  %s1301_s10 = smov [#allocation10]  }
  0x46   :  { %s67_s28 = sshll.u32 %s1300_s27, 4  ;;  %s94_s21 = sshll.u32 %s1301_s10, 4  ;;  %s68_s28 = int_to_ptr.vmem [resolvable:$true] %s67_s28  ;;  %s95_s21 = int_to_ptr.vmem [resolvable:$true] %s94_s21 }
  0x47   :  { %s1196_s29 = scalar_lea.hbm %s1621_s8, 512 }
  0x48   :  { %p1197_p4 = scmp.ne.s32.totalorder %s1621_s8, %s1196_s29  ;;  %p1200_p5 = scmp.lt.u32.totalorder %s1196_s29, %s1621_s8 }
  0x4a   :  { %p1202_p6 = pnand %p1200_p5, %p1197_p4 }
  0x4c   :  { %1205 = shalt.err (!%p1202_p6)
}
  0x4d   :  { %s1206_s4 = scalar_lea.vmem %s68_s28, 512  ;;  %p1211_p8 = scmp.lt.s32.totalorder %s68_s28, %s68_s28 }
  0x4e   :  { %p1207_p7 = scmp.ne.s32.totalorder %s68_s28, %s1206_s4  ;;  %p1212_p9 = scmp.lt.s32.totalorder %s1206_s4, %s1206_s4 }
  0x50   :  { %p1213_p10 = por %p1212_p9, %p1211_p8 }
  0x52   :  { %p1214_p11 = pnand %p1213_p10, %p1207_p7 }
  0x54   :  { %1217 = shalt.err (!%p1214_p11)
}
  0x55   :  { %73 = dma.hbm_to_vmem [thread:$0]  %s1621_s8, 512, %s68_s28, [#allocation6], %s1296_s30, %s1296_s30, %s1297_s16  }
  0x56   :  { %s1218_s17 = scalar_lea.hbm %s1624_s11, 16 }
  0x57   :  { %p1219_p12 = scmp.ne.s32.totalorder %s1624_s11, %s1218_s17  ;;  %p1222_p13 = scmp.lt.u32.totalorder %s1218_s17, %s1624_s11 }
  0x59   :  { %p1224_p0 = pnand %p1222_p13, %p1219_p12 }
  0x5b   :  { %1227 = shalt.err (!%p1224_p0)
}
  0x5c   :  { %s1228_s29 = scalar_lea.vmem %s95_s21, 16  ;;  %s1232_s18 = scalar_lea.vmem %s95_s21, 32 }
  0x5d   :  { %p1229_p1 = scmp.ne.s32.totalorder %s95_s21, %s1228_s29  ;;  %p1233_p2 = scmp.lt.s32.totalorder %s95_s21, %s95_s21 }
  0x5e   :  { %p1234_p3 = scmp.lt.s32.totalorder %s1232_s18, %s1228_s29 }
  0x60   :  { %p1235_p4 = por %p1234_p3, %p1233_p2 }
  0x62   :  { %p1236_p5 = pnand %p1235_p4, %p1229_p1 }
  0x64   :  { %1239 = shalt.err (!%p1236_p5)
}
  0x65   :  { %97 = dma.hbm_to_vmem [thread:$0]  %s1624_s11, 16, %s95_s21, [#allocation9]  }
  0x66   :  { %s1302_s28 = smov [#allocation13]   ;;  %s1240_s4 = scalar_lea.hbm %s1626_s13, 16 }
  0x67   :  { %s116_s22 = sshll.u32 %s1302_s28, 4  ;;  %p1241_p6 = scmp.ne.s32.totalorder %s1626_s13, %s1240_s4  ;;  %s117_s22 = int_to_ptr.vmem [resolvable:$true] %s116_s22 }
  0x68   :  { %p1244_p7 = scmp.lt.u32.totalorder %s1240_s4, %s1626_s13 }
  0x6a   :  { %p1246_p8 = pnand %p1244_p7, %p1241_p6 }
  0x6c   :  { %1249 = shalt.err (!%p1246_p8)
}
  0x6d   :  { %s1250_s17 = scalar_lea.vmem %s117_s22, 16  ;;  %s1254_s11 = scalar_lea.vmem %s117_s22, 32 }
  0x6e   :  { %p1251_p9 = scmp.ne.s32.totalorder %s117_s22, %s1250_s17  ;;  %p1255_p10 = scmp.lt.s32.totalorder %s117_s22, %s117_s22 }
  0x6f   :  { %p1256_p11 = scmp.lt.s32.totalorder %s1254_s11, %s1250_s17 }
  0x71   :  { %p1257_p12 = por %p1256_p11, %p1255_p10 }
  0x73   :  { %p1258_p13 = pnand %p1257_p12, %p1251_p9 }
  0x75   :  { %1261 = shalt.err (!%p1258_p13)
}
  0x76   :  { %119 = dma.hbm_to_vmem [thread:$0]  %s1626_s13, 16, %s117_s22, [#allocation12]  }
  0x77   :  { %1284 = dma.done.wait [#allocation3], 1024  }
  0x78   :  { %1285 = vsyncadd [#allocation3], 4294966272 }
  0x79   :  { %1286 = dma.done.wait [#allocation6], 1536  }
  0x7a   :  { %1287 = vsyncadd [#allocation6], 4294965760 }
  0x7b   :  { %1288 = dma.done.wait [#allocation9], 1040  }
  0x7c   :  { %1289 = vsyncadd [#allocation9], 4294966256 }
  0x7d   :  { %1290 = dma.done.wait [#allocation12], 1040  }
  0x7e   :  { %1291 = vsyncadd [#allocation12], 4294966256  ;;  %v1303_v0 = vmov 0.0   ;;  %vm1304_vm0 = vmmov 0   ;;  %v1058_v1 = vld [vmem:[%s1615_s2] sm:$0xff]   ;;  %v1059_v2 = vld [vmem:[%s1615_s2 + $0x8] sm:$0xff]  }
  0x7f   :  { %934 = vmatprep.subr.bf16.mxu0 %v1303_v0  ;;  %950 = vmatprep.mubr.msk.bf16.mxu0 %vm1304_vm0, %v1303_v0  ;;  %v1060_v3 = vld [vmem:[%s1615_s2 + $0x10] sm:$0xff]   ;;  %v1066_v4 = vld [vmem:[#allocation2] sm:$0xff]   ;;  %v1061_v5 = vld [vmem:[%s1615_s2 + $0x18] sm:$0xff]   ;;  %vm532_vm1 = vcmask 523264  }
  0x80   :  { %954 = vmatprep.subr.bf16.mxu1 %v1303_v0  ;;  %970 = vmatprep.mubr.msk.bf16.mxu1 %vm1304_vm0, %v1303_v0  ;;  %v1067_v6 = vld [vmem:[#allocation2 + $0x8] sm:$0xff]   ;;  %v1062_v7 = vld [vmem:[%s1615_s2 + $0x20] sm:$0xff]   ;;  %v1068_v8 = vld [vmem:[#allocation2 + $0x10] sm:$0xff]  }
  0x81   :  { %935 = vmatpush3.bf16.msra.mxu0 %v1058_v1  ;;  %955 = vmatpush3.bf16.msra.mxu1 %v1066_v4  ;;  %v1063_v9 = vld [vmem:[%s1615_s2 + $0x28] sm:$0xff]   ;;  %v1069_v10 = vld [vmem:[#allocation2 + $0x18] sm:$0xff]   ;;  %v1064_v11 = vld [vmem:[%s1615_s2 + $0x30] sm:$0xff]  }
  0x82   :  { %936 = vmatprep.subr.bf16.mxu0 %v1303_v0  ;;  %956 = vmatprep.subr.bf16.mxu1 %v1303_v0  ;;  %v1070_v12 = vld [vmem:[#allocation2 + $0x20] sm:$0xff]   ;;  %v1065_v13 = vld [vmem:[%s1615_s2 + $0x38] sm:$0xff]   ;;  %v1071_v15 = vld [vmem:[#allocation2 + $0x28] sm:$0xff]  }
  0x83   :  { %v142_v14 = vld [vmem:[%s1613_s0] sm:$0xff]  ;;  %v1072_v17 = vld [vmem:[#allocation2 + $0x30] sm:$0xff]   ;;  %v1073_v18 = vld [vmem:[#allocation2 + $0x38] sm:$0xff]  }
  0x84   :  { %v143_v16 = vpack.c.bf16 %v142_v14, %v142_v14  ;;  %v1074_v19 = vld [vmem:[#allocation5] sm:$0xff]   ;;  %v1075_v20 = vld [vmem:[#allocation5 + $0x8] sm:$0xff]   ;;  %v1076_v21 = vld [vmem:[#allocation5 + $0x10] sm:$0xff]  }
  0x85   :  { %937 = vmatpush3.bf16.msra.mxu0 %v1059_v2  ;;  %957 = vmatpush3.bf16.msra.mxu1 %v1067_v6  ;;  %v1077_v22 = vld [vmem:[#allocation5 + $0x18] sm:$0xff]   ;;  %v1078_v23 = vld [vmem:[#allocation5 + $0x20] sm:$0xff]   ;;  %v1079_v24 = vld [vmem:[#allocation5 + $0x28] sm:$0xff]  }
  0x86   :  { %938 = vmatprep.subr.bf16.mxu0 %v1303_v0  ;;  %958 = vmatprep.subr.bf16.mxu1 %v1303_v0  ;;  %v832_v25 = vld [vmem:[%s1616_s3] ss:$0 sm:$0xff]  ;;  %v1080_v33 = vld [vmem:[#allocation5 + $0x30] sm:$0xff]   ;;  %v1081_v34 = vld [vmem:[#allocation5 + $0x38] sm:$0xff]  }
  0x87   :  { %v841_v35 = vld [vmem:[%s1618_s5] ss:$0 sm:$0xff]  ;;  %v1083_v44 = vld [vmem:[#allocation7 + $0x8] sm:$0xff]   ;;  %v1084_v50 = vld [vmem:[#allocation7 + $0x10] sm:$0xff]  }
  0x88   :  { %v1082_v43 = vld [vmem:[#allocation7] sm:$0xff]   ;;  %v1085_v54 = vld [vmem:[#allocation7 + $0x18] sm:$0xff]   ;;  %v1087_v63 = vld [vmem:[#allocation8 + $0x8] sm:$0xff]  }
  0x89   :  { %939 = vmatpush3.bf16.msra.mxu0 %v1060_v3  ;;  %959 = vmatpush3.bf16.msra.mxu1 %v1068_v8  ;;  %v850_v45 = vld [vmem:[%s1620_s7] ss:$0 sm:$0xff]  ;;  %v1088_v1 = vld [vmem:[#allocation8 + $0x10] sm:$0xff]   ;;  %v1089_v2 = vld [vmem:[#allocation8 + $0x18] sm:$0xff]  }
  0x8a   :  { %940 = vmatprep.subr.bf16.mxu0 %v1303_v0  ;;  %960 = vmatprep.subr.bf16.mxu1 %v1303_v0  ;;  %v484_v56 = vld [vmem:[%s1614_s1] sm:$0xf]  ;;  %v1091_v4 = vld [vmem:[#allocation8 + $0x28] sm:$0xff]   ;;  %v1093_v6 = vld [vmem:[#allocation8 + $0x38] sm:$0xff]  }
  0x8b   :  { %v485_v57 = vunpack.c.l.bf16 %v484_v56  ;;  %v1086_v61 = vld [vmem:[#allocation8] sm:$0xff]   ;;  %v1095_v8 = vld [vmem:[#allocation11 + $0x8] sm:$0xff]  }
  0x8c   :  { %v1090_v3 = vld [vmem:[#allocation8 + $0x20] sm:$0xff]  }
  0x8d   :  { %941 = vmatpush3.bf16.msra.mxu0 %v1061_v5  ;;  %961 = vmatpush3.bf16.msra.mxu1 %v1069_v10  ;;  %v1092_v5 = vld [vmem:[#allocation8 + $0x30] sm:$0xff]   ;;  %v1097_v10 = vld [vmem:[#allocation11 + $0x18] sm:$0xff]  }
  0x8e   :  { %942 = vmatprep.subr.bf16.mxu0 %v1303_v0  ;;  %962 = vmatprep.subr.bf16.mxu1 %v1303_v0 }
  0x91   :  { %943 = vmatpush3.bf16.msra.mxu0 %v1062_v7  ;;  %963 = vmatpush3.bf16.msra.mxu1 %v1070_v12  ;;  %v1094_v7 = vld [vmem:[#allocation11] sm:$0xff]   ;;  %v1099_v12 = vld [vmem:[#allocation11 + $0x28] sm:$0xff]  }
  0x92   :  { %944 = vmatprep.subr.bf16.mxu0 %v1303_v0  ;;  %964 = vmatprep.subr.bf16.mxu1 %v1303_v0 }
  0x95   :  { %945 = vmatpush3.bf16.msra.mxu0 %v1063_v9  ;;  %965 = vmatpush3.bf16.msra.mxu1 %v1071_v15  ;;  %v1096_v9 = vld [vmem:[#allocation11 + $0x10] sm:$0xff]  }
  0x96   :  { %946 = vmatprep.subr.bf16.mxu0 %v1303_v0  ;;  %966 = vmatprep.subr.bf16.mxu1 %v1303_v0 }
  0x99   :  { %947 = vmatpush3.bf16.msra.mxu0 %v1064_v11  ;;  %967 = vmatpush3.bf16.msra.mxu1 %v1072_v17  ;;  %v1098_v11 = vld [vmem:[#allocation11 + $0x20] sm:$0xff]  }
  0x9a   :  { %948 = vmatprep.subr.bf16.mxu0 %v1303_v0  ;;  %968 = vmatprep.subr.bf16.mxu1 %v1303_v0 }
  0x9d   :  { %949 = vmatpush3.bf16.msra.mxu0 %v1065_v13  ;;  %969 = vmatpush3.bf16.msra.mxu1 %v1073_v18  ;;  %v859_v13 = vld [vmem:[%s1622_s9] ss:$0 sm:$0xff]  ;;  %s1305_s9 = smov [#allocation14]  }
  0x9e   :  { %974 = vmatprep.subr.bf16.mxu0 %v1303_v0  ;;  %994 = vmatprep.subr.bf16.mxu1 %v1303_v0 }
  0xa0   :  { %951 = vmatmul.mubr.bf16.vlgmr.msra.gmra.mrb[0].mxu0 %v143_v16 }
  0xa1   :  { %990 = vmatprep.mubr.msk.bf16.mxu0 %vm1304_vm0, %v1303_v0  ;;  %975 = vmatpush3.bf16.msra.mxu0 %v1074_v19 }
  0xa2   :  { %976 = vmatprep.subr.bf16.mxu0 %v1303_v0 }
  0xa5   :  { %977 = vmatpush3.bf16.msra.mxu0 %v1075_v20 }
  0xa6   :  { %978 = vmatprep.subr.bf16.mxu0 %v1303_v0 }
  0xa9   :  { %979 = vmatpush3.bf16.msra.mxu0 %v1076_v21  ;;  %v1100_v21 = vld [vmem:[#allocation11 + $0x30] sm:$0xff]  }
  0xaa   :  { %980 = vmatprep.subr.bf16.mxu0 %v1303_v0 }
  0xad   :  { %981 = vmatpush3.bf16.msra.mxu0 %v1077_v22  ;;  %v1101_v22 = vld [vmem:[#allocation11 + $0x38] sm:$0xff]  }
  0xae   :  { %982 = vmatprep.subr.bf16.mxu0 %v1303_v0 }
  0xb1   :  { %983 = vmatpush3.bf16.msra.mxu0 %v1078_v23  ;;  %v865_v23 = vld [vmem:[#allocation10] ss:$0 sm:$0xff] }
  0xb2   :  { %984 = vmatprep.subr.bf16.mxu0 %v1303_v0 }
  0xb5   :  { %985 = vmatpush3.bf16.msra.mxu0 %v1079_v24 }
  0xb6   :  { %986 = vmatprep.subr.bf16.mxu0 %v1303_v0 }
  0xb9   :  { %987 = vmatpush3.bf16.msra.mxu0 %v1080_v33 }
  0xba   :  { %988 = vmatprep.subr.bf16.mxu0 %v1303_v0 }
  0xbd   :  { %989 = vmatpush3.bf16.msra.mxu0 %v1081_v34 }
  0xbe   :  { %1026 = vmatprep.subr.bf16.mxu0 %v1303_v0 }
 0x173   :  { %v249_v26 = vpop.f32.mrb[0].mxu0 }
 0x174   :  { %v250_v27 = vadd.f32 %v832_v25, %v249_v26  ;;  %v952_v28 = vpop.f32.mrb[1].mxu0 }
 0x175   :  { %v252_v29 = vpop.f32.mrb[2].mxu0 }
 0x176   :  { %v255_v30 = vmax.f32 %v250_v27, 0.0  ;;  %v953_v31 = vpop.f32.mrb[3].mxu0 }
 0x177   :  { %v874_v31 = vld [vmem:[#allocation13] ss:$0 sm:$0xff] }
 0x178   :  { %v256_v32 = vpack.c.bf16 %v255_v30, %v255_v30 }
 0x17a   :  { %971 = vmatmul.mubr.bf16.vlgmr.msra.gmra.mrb[0].mxu1 %v256_v32 }
 0x17b   :  { %1002 = vmatprep.mubr.msk.bf16.mxu1 %vm1304_vm0, %v1303_v0  ;;  %995 = vmatpush3.bf16.msra.mxu1 %v1082_v43 }
 0x17c   :  { %996 = vmatprep.subr.bf16.mxu1 %v1303_v0 }
 0x17f   :  { %997 = vmatpush3.bf16.msra.mxu1 %v1083_v44 }
 0x180   :  { %998 = vmatprep.subr.bf16.mxu1 %v1303_v0 }
 0x183   :  { %999 = vmatpush3.bf16.msra.mxu1 %v1084_v50 }
 0x184   :  { %1000 = vmatprep.subr.bf16.mxu1 %v1303_v0 }
 0x187   :  { %1001 = vmatpush3.bf16.msra.mxu1 %v1085_v54 }
 0x188   :  { %1006 = vmatprep.subr.bf16.mxu1 %v1303_v0 }
 0x24d   :  { %v362_v36 = vpop.f32.mrb[0].mxu1 }
 0x24e   :  { %v363_v37 = vadd.f32 %v841_v35, %v362_v36  ;;  %v972_v38 = vpop.f32.mrb[1].mxu1 }
 0x24f   :  { %v365_v39 = vpop.f32.mrb[2].mxu1 }
 0x250   :  { %v368_v40 = vmax.f32 %v363_v37, 0.0  ;;  %v973_v41 = vpop.f32.mrb[3].mxu1 }
 0x252   :  { %v369_v42 = vpack.c.bf16 %v368_v40, %v368_v40 }
 0x254   :  { %991 = vmatmul.mubr.bf16.vlgmr.msra.gmra.mrb[4].mxu0 %v369_v42 }
 0x255   :  { %1042 = vmatprep.mubr.msk.bf16.mxu0 %vm1304_vm0, %v1303_v0  ;;  %1027 = vmatpush3.bf16.msra.mxu0 %v1094_v7 }
 0x256   :  { %1028 = vmatprep.subr.bf16.mxu0 %v1303_v0 }
 0x259   :  { %1029 = vmatpush3.bf16.msra.mxu0 %v1095_v8 }
 0x25a   :  { %1030 = vmatprep.subr.bf16.mxu0 %v1303_v0 }
 0x25d   :  { %1031 = vmatpush3.bf16.msra.mxu0 %v1096_v9 }
 0x25e   :  { %1032 = vmatprep.subr.bf16.mxu0 %v1303_v0 }
 0x261   :  { %1033 = vmatpush3.bf16.msra.mxu0 %v1097_v10 }
 0x262   :  { %1034 = vmatprep.subr.bf16.mxu0 %v1303_v0 }
 0x265   :  { %1035 = vmatpush3.bf16.msra.mxu0 %v1098_v11 }
 0x266   :  { %1036 = vmatprep.subr.bf16.mxu0 %v1303_v0 }
 0x269   :  { %1037 = vmatpush3.bf16.msra.mxu0 %v1099_v12 }
 0x26a   :  { %1038 = vmatprep.subr.bf16.mxu0 %v1303_v0 }
 0x26d   :  { %1039 = vmatpush3.bf16.msra.mxu0 %v1100_v21 }
 0x26e   :  { %1040 = vmatprep.subr.bf16.mxu0 %v1303_v0 }
 0x271   :  { %1041 = vmatpush3.bf16.msra.mxu0 %v1101_v22 }
 0x327   :  { %v475_v46 = vpop.f32.mrb[4].mxu0 }
 0x328   :  { %v476_v47 = vadd.f32 %v850_v45, %v475_v46  ;;  %v992_v48 = vpop.f32.mrb[5].mxu0 }
 0x329   :  { %v478_v49 = vpop.f32.mrb[6].mxu0 }
 0x32a   :  { %809 = vst [vmem:[%s1628_s15] sm:$0xff] %v476_v47  ;;  %v993_v51 = vpop.f32.mrb[7].mxu0  ;;  %v481_v52 = vmul.f32 0.5, %v476_v47 }
 0x32c   :  { %v482_v53 = vmul.f32 1.442695, %v481_v52 }
 0x32e   :  { %1102 = vpow2.f32 %v482_v53 }
 0x338   :  { %v1103_v55 = vpop.eup %1102 }
 0x339   :  { %487 = vrot.lane.b32.xlu0 %v1103_v55, %s1296_s30  ;;  %s816_s30 = sshll.u32 %s1305_s9, 4  ;;  %s817_s30 = int_to_ptr.vmem [resolvable:$true] %s816_s30 }
 0x33a   :  { %s1262_s6 = scalar_lea.vmem %s817_s30, 128  ;;  %p1267_p1 = scmp.lt.s32.totalorder %s817_s30, %s817_s30 }
 0x33b   :  { %p1263_p0 = scmp.ne.s32.totalorder %s817_s30, %s1262_s6  ;;  %p1268_p2 = scmp.lt.s32.totalorder %s1262_s6, %s1262_s6 }
 0x33d   :  { %p1269_p3 = por %p1268_p2, %p1267_p1 }
 0x33f   :  { %p1270_p4 = pnand %p1269_p3, %p1263_p0 }
 0x3ab   :  { %v488_v58 = vpop.permute.xlu0 %487 }
 0x3ac   :  { %v490_v59 = vmul.f32 %v488_v58, %v485_v57 }
 0x3ae   :  { %v491_v60 = vadd.f32 %v490_v59, %v476_v47 }
 0x3b0   :  { %v492_v62 = vpack.c.bf16 %v491_v60, %v491_v60 }
 0x3b2   :  { %1003 = vmatmul.mubr.msk.bf16.vlgmr.msra.gmra.mrb[4].mxu1 %vm532_vm1, %v492_v62 }
 0x3b3   :  { %1007 = vmatpush3.bf16.msra.mxu1 %v1086_v61  ;;  %1022 = vmatprep.mubr.msk.bf16.mxu1 %vm1304_vm0, %v1303_v0 }
 0x3b4   :  { %1008 = vmatprep.subr.bf16.mxu1 %v1303_v0 }
 0x3b7   :  { %1009 = vmatpush3.bf16.msra.mxu1 %v1087_v63 }
 0x3b8   :  { %1010 = vmatprep.subr.bf16.mxu1 %v1303_v0 }
 0x3bb   :  { %1011 = vmatpush3.bf16.msra.mxu1 %v1088_v1 }
 0x3bc   :  { %1012 = vmatprep.subr.bf16.mxu1 %v1303_v0 }
 0x3bf   :  { %1013 = vmatpush3.bf16.msra.mxu1 %v1089_v2 }
 0x3c0   :  { %1014 = vmatprep.subr.bf16.mxu1 %v1303_v0 }
 0x3c3   :  { %1015 = vmatpush3.bf16.msra.mxu1 %v1090_v3 }
 0x3c4   :  { %1016 = vmatprep.subr.bf16.mxu1 %v1303_v0 }
 0x3c7   :  { %1017 = vmatpush3.bf16.msra.mxu1 %v1091_v4 }
 0x3c8   :  { %1018 = vmatprep.subr.bf16.mxu1 %v1303_v0 }
 0x3cb   :  { %1019 = vmatpush3.bf16.msra.mxu1 %v1092_v5 }
 0x3cc   :  { %1020 = vmatprep.subr.bf16.mxu1 %v1303_v0 }
 0x3cf   :  { %1021 = vmatpush3.bf16.msra.mxu1 %v1093_v6 }
 0x485   :  { %v570_v14 = vpop.f32.mrb[4].mxu1 }
 0x486   :  { %v571_v15 = vadd.f32 %v859_v13, %v570_v14  ;;  %v1004_v16 = vpop.f32.mrb[5].mxu1 }
 0x487   :  { %v573_v17 = vpop.f32.mrb[6].mxu1 }
 0x488   :  { %v576_v18 = vmax.f32 %v571_v15, 0.0  ;;  %v1005_v19 = vpop.f32.mrb[7].mxu1 }
 0x48a   :  { %v577_v20 = vpack.c.bf16 %v576_v18, %v576_v18 }
 0x48c   :  { %1023 = vmatmul.mubr.bf16.vlgmr.msra.gmra.mrb[8].mxu1 %v577_v20 }
 0x55f   :  { %v683_v24 = vpop.f32.mrb[8].mxu1 }
 0x560   :  { %v684_v25 = vadd.f32 %v865_v23, %v683_v24  ;;  %v1024_v26 = vpop.f32.mrb[9].mxu1 }
 0x561   :  { %v686_v27 = vpop.f32.mrb[10].mxu1 }
 0x562   :  { %v689_v28 = vmax.f32 %v684_v25, 0.0  ;;  %v1025_v29 = vpop.f32.mrb[11].mxu1 }
 0x564   :  { %v690_v30 = vpack.c.bf16 %v689_v28, %v689_v28 }
 0x566   :  { %1043 = vmatmul.mubr.bf16.vlgmr.msra.gmra.mrb[8].mxu0 %v690_v30 }
 0x639   :  { %v796_v32 = vpop.f32.mrb[8].mxu0 }
 0x63a   :  { %v797_v33 = vadd.f32 %v874_v31, %v796_v32  ;;  %v1044_v34 = vpop.f32.mrb[9].mxu0 }
 0x63b   :  { %v799_v35 = vpop.f32.mrb[10].mxu0 }
 0x63c   :  { %v883_v36 = vmul.f32 -1.442695, %v797_v33  ;;  %v1045_v37 = vpop.f32.mrb[11].mxu0 }
 0x63e   :  { %1104 = vpow2.f32 %v883_v36 }
 0x648   :  { %v1105_v0 = vpop.eup %1104 }
 0x649   :  { %v805_v38 = vadd.f32 1.0, %v1105_v0 }
 0x64b   :  { %1106 = vrcp.f32 %v805_v38 }
 0x655   :  { %v1107_v39 = vpop.eup %1106 }
 0x656   :  { %808 = vst [vmem:[#allocation14] sm:$0xff] %v1107_v39 }
 0x657   :  { %1273 = shalt.err (!%p1270_p4)
}
 0x658   :  { %s1274_s18 = scalar_lea.hbm %s1627_s14, 128 }
 0x659   :  { %p1275_p5 = scmp.ne.s32.totalorder %s1627_s14, %s1274_s18  ;;  %p1278_p6 = scmp.lt.u32.totalorder %s1274_s18, %s1627_s14 }
 0x65b   :  { %p1280_p7 = pnand %p1278_p6, %p1275_p5 }
 0x65d   :  { %1283 = shalt.err (!%p1280_p7)
}
 0x65e   :  { %819 = dma.vmem_to_hbm [thread:$0]  %s817_s30, 128, %s1627_s14, [#allocation4]  }
 0x65f   :  { %1292 = dma.done.wait [#allocation4], 128  }
 0x660   :  { %1293 = vsyncadd [#allocation4], 4294967168 }
 0x661   :  { %827 = vsyncpa [#allocation3], 1 }
 0x662   :  { %828 = vsyncpa [#allocation6], 1 }
 0x663   :  { %829 = vsyncpa [#allocation9], 1 }
 0x664   :  { %830 = vsyncpa [#allocation12], 1 }
 0x665   :  { %831 = vsyncpa [#allocation4], 1 }

</bundles_post_ra>
